<compile_context>
chip_gen: v5e
topology: v5e:2x2
jax: 0.10.0
libtpu: 0.0.40
codegen_flags: <defaults>
</compile_context>

<pallas_src>
import functools

import numpy as np
import jax
import jax.numpy as jnp
from jax.experimental import pallas as pl
from jax.experimental.pallas import tpu as pltpu


def _round_up(v, m):
    return (v + m - 1) // m * m


def _fc_fused_kernel(*refs, num_layers, inv_sqrt_d, inv_batch):
    """All L+1 layers for one batch tile; activations stay resident on-chip.

    refs = (x_ref, w_0_ref, ..., w_L_ref, o_ref).
    w_i_ref holds W_i pre-transposed to (in_pad, out_pad) in bf16.
    """
    x_ref = refs[0]
    w_refs = refs[1:1 + num_layers + 1]
    o_ref = refs[1 + num_layers + 1]

    cur = x_ref[...].astype(jnp.bfloat16)                     # (TM, d_pad) bf16 -> MXU
    for i in range(num_layers):                               # hidden layers (unrolled)
        acc = jax.lax.dot_general(
            cur, w_refs[i][...],
            dimension_numbers=(((1,), (0,)), ((), ())),       # K along W's sublane dim
            preferred_element_type=jnp.float32)               # f32 accumulation
        acc = jnp.maximum(acc * jnp.float32(inv_sqrt_d), 0.0)  # scale + ReLU in f32
        cur = acc.astype(jnp.bfloat16)
    acc = jax.lax.dot_general(                                # last layer, no activation
        cur, w_refs[num_layers][...],
        dimension_numbers=(((1,), (0,)), ((), ())),
        preferred_element_type=jnp.float32)
    o_ref[...] = (acc * jnp.float32(inv_batch)).astype(o_ref.dtype)


def fc_forward(x, weights, *, tm=256):
    """weights = [W_0, ..., W_L] with W_i stored PyTorch-style as (out, in)."""
    n, d = x.shape                  # matches `h, d = x.size()` in the PyTorch forward
    L = len(weights) - 1
    c = weights[-1].shape[0]

    # ---- pad / layout preparation (host side, once) -------------------------
    d_pad = _round_up(d, 128)
    c_pad = _round_up(c, 128)

    TM = _round_up(min(tm, _round_up(n, 8)), 8)   # batch tile (>= 8, <= tm)
    n_pad = _round_up(n, TM)

    x_pad = jnp.zeros((n_pad, d_pad), jnp.float32).at[:n, :d].set(
        x.astype(jnp.float32))

    wts = []
    for i, W in enumerate(weights):
        out_dim, in_dim = W.shape
        in_p = _round_up(in_dim, 128)
        out_p = c_pad if i == L else _round_up(out_dim, 128)
        Wt = jnp.zeros((in_p, out_p), jnp.bfloat16).at[:in_dim, :out_dim].set(
            jnp.asarray(W).T.astype(jnp.bfloat16))
        wts.append(Wt)

    # ---- VMEM budget + cost estimate ----------------------------------------
    w_bytes = sum(int(np.prod(w.shape)) * 2 for w in wts)             # resident bf16 weights
    widest = max([d_pad] + [int(w.shape[1]) for w in wts])
    act_bytes = 2 * TM * widest * 4                                   # f32 accum + bf16 copy
    io_bytes = 2 * TM * d_pad * 4 + 2 * TM * c_pad * 4                # double-buffered tiles
    vmem_limit = int(min(max(2 * (w_bytes + act_bytes + io_bytes) + (4 << 20),
                             32 << 20), 56 << 20))

    flops = 2 * n_pad * sum(int(w.shape[0]) * int(w.shape[1]) for w in wts)
    bytes_accessed = x_pad.size * 4 + w_bytes + n_pad * c_pad * 4
    cost = pl.CostEstimate(flops=flops, transcendentals=0,
                           bytes_accessed=bytes_accessed)

    kernel = functools.partial(
        _fc_fused_kernel,
        num_layers=L,
        inv_sqrt_d=1.0 / float(np.sqrt(d)),   # ORIGINAL input dim, per the PyTorch code
        inv_batch=1.0 / float(n),             # BATCH size (PyTorch's `h`)
    )

    out_padded = pl.pallas_call(
        kernel,
        out_shape=jax.ShapeDtypeStruct((n_pad, c_pad), jnp.float32),
        grid=(n_pad // TM,),
        in_specs=[pl.BlockSpec((TM, d_pad), lambda i: (i, 0))] +
                 [pl.BlockSpec(w.shape, lambda i: (0, 0)) for w in wts],
        out_specs=pl.BlockSpec((TM, c_pad), lambda i: (i, 0)),
        compiler_params=pltpu.CompilerParams(
            dimension_semantics=("parallel",),
            vmem_limit_bytes=vmem_limit),
        cost_estimate=cost,
    )(x_pad, *wts)

    out = out_padded[:n, :c]
    if c == 1:
        return out.reshape(-1)
    return out


def init_fc_params(key, d, h, c, L):
    """Same shapes as the PyTorch module: W_i is (h, hh) for i<L, W_L is (c, hh).
    The ParameterList chunking in __init__ is concatenated back in forward, so a
    single full matrix per layer is equivalent."""
    weights = []
    hh = d
    for _ in range(L):
        key, sub = jax.random.split(key)
        weights.append(jax.random.normal(sub, (h, hh), dtype=jnp.float32))
        hh = h
    key, sub = jax.random.split(key)
    weights.append(jax.random.normal(sub, (c, hh), dtype=jnp.float32))
    return weights


if __name__ == "__main__":
    # Small shapes consistent with the forward: x is (batch, d).
    batch, d, h, c, L = 8, 32, 32, 1, 2

    key = jax.random.PRNGKey(0)
    key, kx = jax.random.split(key)
    x = jax.random.normal(kx, (batch, d), dtype=jnp.float32)
    weights = init_fc_params(key, d, h, c, L)

    out = jax.block_until_ready(fc_forward(x, weights))

    # Pure-JAX reference with matching numerics (bf16 MXU inputs, f32 accumulation).
    ref = x
    for i in range(L):
        y = jax.lax.dot_general(
            ref.astype(jnp.bfloat16), weights[i].astype(jnp.bfloat16),
            dimension_numbers=(((1,), (1,)), ((), ())),
            preferred_element_type=jnp.float32)
        ref = jnp.maximum(y / np.sqrt(d), 0.0)
    y = jax.lax.dot_general(
        ref.astype(jnp.bfloat16), weights[L].astype(jnp.bfloat16),
        dimension_numbers=(((1,), (1,)), ((), ())),
        preferred_element_type=jnp.float32)
    ref = y / batch
    if ref.shape[1] == 1:
        ref = ref.reshape(-1)

    np.testing.assert_allclose(np.asarray(out), np.asarray(ref), rtol=1e-2, atol=1e-2)

    print("KERNEL_OK")
</pallas_src>

<mosaic_0001>
module attributes {stable_mosaic.version = 11 : i64} {
  func.func @_fc_fused_kernel(%arg0: i32, %arg1: memref<8x128xf32, #tpu.memory_space<vmem>>, %arg2: memref<128x128xbf16, #tpu.memory_space<vmem>>, %arg3: memref<128x128xbf16, #tpu.memory_space<vmem>>, %arg4: memref<128x128xbf16, #tpu.memory_space<vmem>>, %arg5: memref<8x128xf32, #tpu.memory_space<vmem>>) attributes {dimension_semantics = [#tpu.dimension_semantics<parallel>], iteration_bounds = array<i64: 1>, scalar_prefetch = 0 : i64, scratch_operands = 0 : i64, tpu.core_type = #tpu.core_type<tc>, window_params = [{transform_indices = @transform_0, window_bounds = array<i64: 8, 128>}, {pipeline_mode = #tpu.pipeline_mode<synchronous>, transform_indices = @transform_1, window_bounds = array<i64: 128, 128>}, {pipeline_mode = #tpu.pipeline_mode<synchronous>, transform_indices = @transform_2, window_bounds = array<i64: 128, 128>}, {pipeline_mode = #tpu.pipeline_mode<synchronous>, transform_indices = @transform_3, window_bounds = array<i64: 128, 128>}, {transform_indices = @transform_4, window_bounds = array<i64: 8, 128>}]} {
    %c0 = arith.constant 0 : index
    %c0_0 = arith.constant 0 : index
    %0 = vector.load %arg1[%c0, %c0_0] : memref<8x128xf32, #tpu.memory_space<vmem>>, vector<8x128xf32>
    %1 = arith.truncf %0 : vector<8x128xf32> to vector<8x128xbf16>
    %c0_1 = arith.constant 0 : index
    %c0_2 = arith.constant 0 : index
    %2 = vector.load %arg2[%c0_1, %c0_2] : memref<128x128xbf16, #tpu.memory_space<vmem>>, vector<128x128xbf16>
    %cst = arith.constant dense<0.000000e+00> : vector<8x128xf32>
    %3 = tpu.matmul %1, %2, %cst {dimension_numbers = #tpu.dot_dimension_numbers<[1], [0], [0], [1], [0, 0, 1, 1], [], []>} : vector<8x128xbf16>, vector<128x128xbf16>, vector<8x128xf32> -> vector<8x128xf32>
    %cst_3 = arith.constant 0.176776692 : f32
    %4 = vector.broadcast %cst_3 : f32 to vector<8x128xf32>
    %5 = arith.mulf %3, %4 : vector<8x128xf32>
    %cst_4 = arith.constant 0.000000e+00 : f32
    %6 = vector.broadcast %cst_4 : f32 to vector<8x128xf32>
    %7 = arith.maximumf %5, %6 : vector<8x128xf32>
    %8 = arith.truncf %7 : vector<8x128xf32> to vector<8x128xbf16>
    %c0_5 = arith.constant 0 : index
    %c0_6 = arith.constant 0 : index
    %9 = vector.load %arg3[%c0_5, %c0_6] : memref<128x128xbf16, #tpu.memory_space<vmem>>, vector<128x128xbf16>
    %cst_7 = arith.constant dense<0.000000e+00> : vector<8x128xf32>
    %10 = tpu.matmul %8, %9, %cst_7 {dimension_numbers = #tpu.dot_dimension_numbers<[1], [0], [0], [1], [0, 0, 1, 1], [], []>} : vector<8x128xbf16>, vector<128x128xbf16>, vector<8x128xf32> -> vector<8x128xf32>
    %cst_8 = arith.constant 0.176776692 : f32
    %11 = vector.broadcast %cst_8 : f32 to vector<8x128xf32>
    %12 = arith.mulf %10, %11 : vector<8x128xf32>
    %cst_9 = arith.constant 0.000000e+00 : f32
    %13 = vector.broadcast %cst_9 : f32 to vector<8x128xf32>
    %14 = arith.maximumf %12, %13 : vector<8x128xf32>
    %15 = arith.truncf %14 : vector<8x128xf32> to vector<8x128xbf16>
    %c0_10 = arith.constant 0 : index
    %c0_11 = arith.constant 0 : index
    %16 = vector.load %arg4[%c0_10, %c0_11] : memref<128x128xbf16, #tpu.memory_space<vmem>>, vector<128x128xbf16>
    %cst_12 = arith.constant dense<0.000000e+00> : vector<8x128xf32>
    %17 = tpu.matmul %15, %16, %cst_12 {dimension_numbers = #tpu.dot_dimension_numbers<[1], [0], [0], [1], [0, 0, 1, 1], [], []>} : vector<8x128xbf16>, vector<128x128xbf16>, vector<8x128xf32> -> vector<8x128xf32>
    %cst_13 = arith.constant 1.250000e-01 : f32
    %18 = vector.broadcast %cst_13 : f32 to vector<8x128xf32>
    %19 = arith.mulf %17, %18 : vector<8x128xf32>
    %c0_14 = arith.constant 0 : index
    %c0_15 = arith.constant 0 : index
    %20 = vector.load %arg5[%c0_14, %c0_15] : memref<8x128xf32, #tpu.memory_space<vmem>>, vector<8x128xf32>
    tpu.vector_store %arg5[%c0_14, %c0_15], %19 {strides = array<i32>} : memref<8x128xf32, #tpu.memory_space<vmem>>, vector<8x128xf32>,
    return
  }
  func.func @transform_0(%arg0: i32) -> (i32, i32) {
    %c0_i32 = arith.constant 0 : i32
    %c0_i32_0 = arith.constant 0 : i32
    return %arg0, %c0_i32 : i32, i32
  }
  func.func @transform_1(%arg0: i32) -> (i32, i32) {
    %c0_i32 = arith.constant 0 : i32
    %c0_i32_0 = arith.constant 0 : i32
    %c0_i32_1 = arith.constant 0 : i32
    return %c0_i32, %c0_i32_0 : i32, i32
  }
  func.func @transform_2(%arg0: i32) -> (i32, i32) {
    %c0_i32 = arith.constant 0 : i32
    %c0_i32_0 = arith.constant 0 : i32
    %c0_i32_1 = arith.constant 0 : i32
    return %c0_i32, %c0_i32_0 : i32, i32
  }
  func.func @transform_3(%arg0: i32) -> (i32, i32) {
    %c0_i32 = arith.constant 0 : i32
    %c0_i32_0 = arith.constant 0 : i32
    %c0_i32_1 = arith.constant 0 : i32
    return %c0_i32, %c0_i32_0 : i32, i32
  }
  func.func @transform_4(%arg0: i32) -> (i32, i32) {
    %c0_i32 = arith.constant 0 : i32
    %c0_i32_0 = arith.constant 0 : i32
    return %arg0, %c0_i32 : i32, i32
  }
}

</mosaic_0001>

<bundles_post_ra>
// kernel: tpu_custom_call.1
= control target key start
LH: loop header
LB: loop body
LE: loop exit
PB: predicated region body
PF: predicated region fallthrough
CT: control target
= control target key end

     0   :  { %9 = vsyncpa [#allocation3], 0  ;;  %s641_s0 = inlined_call_operand.hbm [shape: f32[8,128], index: 0, kind: input, shape index: {}]   ;;  %s642_s1 = inlined_call_operand.hbm [shape: bf16[128,128], index: 1, kind: input, shape index: {}]   ;;  %s643_s2 = inlined_call_operand.hbm [shape: bf16[128,128], index: 2, kind: input, shape index: {}]   ;;  %s644_s3 = inlined_call_operand.hbm [shape: bf16[128,128], index: 3, kind: input, shape index: {}]   ;;  %s645_s4 = inlined_call_operand.hbm [shape: f32[8,128], index: 4, kind: output, shape index: {}]  }
   0x1   :  { %10 = vsyncpa [#allocation6], 0 }
   0x2   :  { %11 = vsyncpa [#allocation9], 0  ;;  %s28_s17 = sshll.u32 %s642_s1, 4  ;;  %s29_s17 = int_to_ptr.hbm [resolvable:$true] %s28_s17 }
   0x3   :  { %12 = vsyncpa [#allocation4], 0  ;;  %s594_s18 = smov [#allocation5]   ;;  %s18_s22 = sshll.u32 %s641_s0, 4  ;;  %s19_s22 = int_to_ptr.hbm [resolvable:$true] %s18_s22 }
   0x4   :  { %s30_s19 = sshll.u32 %s594_s18, 4  ;;  %s595_s23 = smov 64   ;;  %s31_s19 = int_to_ptr.vmem [resolvable:$true] %s30_s19 }
   0x5   :  { %s596_s24 = smov 4   ;;  %s597_s25 = smov [#allocation2]  }
   0x6   :  { %36 = dma.hbm_to_vmem [thread:$0]  %s29_s17, 1024, %s31_s19, [#allocation6], %s595_s23, %s595_s23, %s596_s24  }
   0x7   :  { %s20_s26 = sshll.u32 %s597_s25, 4  ;;  %s41_s29 = sshll.u32 %s643_s2, 4  ;;  %s21_s26 = int_to_ptr.vmem [resolvable:$true] %s20_s26  ;;  %s42_s29 = int_to_ptr.hbm [resolvable:$true] %s41_s29 }
   0x8   :  { %23 = dma.hbm_to_vmem [thread:$0]  %s19_s22, 128, %s21_s26, [#allocation3]  }
   0x9   :  { %s54_s5 = sshll.u32 %s644_s3, 4  ;;  %s598_s6 = smov [#allocation7]   ;;  %s55_s5 = int_to_ptr.hbm [resolvable:$true] %s54_s5 }
   0xa   :  { %s43_s7 = sshll.u32 %s598_s6, 4  ;;  %s599_s0 = smov [#allocation8]   ;;  %s44_s7 = int_to_ptr.vmem [resolvable:$true] %s43_s7 }
   0xb   :  { %49 = dma.hbm_to_vmem [thread:$0]  %s42_s29, 1024, %s44_s7, [#allocation6], %s595_s23, %s595_s23, %s596_s24  }
   0xc   :  { %s56_s8 = sshll.u32 %s599_s0, 4  ;;  %s57_s8 = int_to_ptr.vmem [resolvable:$true] %s56_s8 }
   0xd   :  { %62 = dma.hbm_to_vmem [thread:$0]  %s55_s5, 1024, %s57_s8, [#allocation9], %s595_s23, %s595_s23, %s596_s24  }
   0xe   :  { %586 = dma.done.wait [#allocation3], 128  }
   0xf   :  { %587 = vsyncadd [#allocation3], 4294967168 }
  0x10   :  { %588 = dma.done.wait [#allocation6], 2048  }
  0x11   :  { %589 = vsyncadd [#allocation6], 4294965248 }
  0x12   :  { %590 = dma.done.wait [#allocation9], 1024  }
  0x13   :  { %591 = vsyncadd [#allocation9], 4294966272  ;;  %v442_v0 = vld [vmem:[#allocation5 + $0x38] sm:$0xff]  ;;  %v441_v1 = vld [vmem:[#allocation5 + $0x30] sm:$0xff]  ;;  %s600_s2 = smov [#allocation10]   ;;  %s327_s11 = sshll.u32 %s645_s4, 4  ;;  %s328_s11 = int_to_ptr.hbm [resolvable:$true] %s327_s11 }
  0x14   :  { %145 = vmatpush.bf16.msra.mxu0 %v442_v0  ;;  %v450_v2 = vld [vmem:[#allocation7 + $0x38] sm:$0xff]  ;;  %v449_v3 = vld [vmem:[#allocation7 + $0x30] sm:$0xff]  ;;  %v440_v4 = vld [vmem:[#allocation5 + $0x28] sm:$0xff]  ;;  %s325_s3 = sshll.u32 %s600_s2, 4  ;;  %s326_s3 = int_to_ptr.vmem [resolvable:$true] %s325_s3 }
  0x15   :  { %225 = vmatpush.bf16.msra.mxu1 %v450_v2  ;;  %v448_v5 = vld [vmem:[#allocation7 + $0x28] sm:$0xff]  ;;  %v439_v6 = vld [vmem:[#allocation5 + $0x20] sm:$0xff]  ;;  %v438_v8 = vld [vmem:[#allocation5 + $0x18] sm:$0xff] }
  0x16   :  { %v447_v7 = vld [vmem:[#allocation7 + $0x20] sm:$0xff]  ;;  %v446_v9 = vld [vmem:[#allocation7 + $0x18] sm:$0xff]  ;;  %v437_v10 = vld [vmem:[#allocation5 + $0x10] sm:$0xff] }
  0x17   :  { %v445_v11 = vld [vmem:[#allocation7 + $0x10] sm:$0xff]  ;;  %v436_v12 = vld [vmem:[#allocation5 + $0x8] sm:$0xff]  ;;  %v435_v13 = vld [vmem:[#allocation5] sm:$0xff] }
  0x18   :  { %146 = vmatpush.bf16.msra.mxu0 %v441_v1  ;;  %v79_v14 = vld [vmem:[#allocation2] sm:$0xff]  ;;  %v444_v16 = vld [vmem:[#allocation7 + $0x8] sm:$0xff]  ;;  %v443_v17 = vld [vmem:[#allocation7] sm:$0xff] }
  0x19   :  { %226 = vmatpush.bf16.msra.mxu1 %v449_v3  ;;  %v80_v15 = vpack.c.bf16 %v79_v14, %v79_v14  ;;  %v458_v18 = vld [vmem:[#allocation8 + $0x38] sm:$0xff]  ;;  %v457_v19 = vld [vmem:[#allocation8 + $0x30] sm:$0xff]  ;;  %v456_v20 = vld [vmem:[#allocation8 + $0x28] sm:$0xff] }
  0x1a   :  { %305 = vmatpush.bf16.msra.mxu2 %v458_v18  ;;  %v455_v21 = vld [vmem:[#allocation8 + $0x20] sm:$0xff]  ;;  %v454_v22 = vld [vmem:[#allocation8 + $0x18] sm:$0xff]  ;;  %v453_v23 = vld [vmem:[#allocation8 + $0x10] sm:$0xff] }
  0x1b   :  { %v452_v29 = vld [vmem:[#allocation8 + $0x8] sm:$0xff]  ;;  %v451_v30 = vld [vmem:[#allocation8] sm:$0xff] }
  0x1c   :  { %147 = vmatpush.bf16.msra.mxu0 %v440_v4 }
  0x1d   :  { %227 = vmatpush.bf16.msra.mxu1 %v448_v5 }
  0x1e   :  { %306 = vmatpush.bf16.msra.mxu2 %v457_v19 }
  0x20   :  { %148 = vmatpush.bf16.msra.mxu0 %v439_v6 }
  0x21   :  { %228 = vmatpush.bf16.msra.mxu1 %v447_v7 }
  0x22   :  { %307 = vmatpush.bf16.msra.mxu2 %v456_v20 }
  0x24   :  { %149 = vmatpush.bf16.msra.mxu0 %v438_v8 }
  0x25   :  { %229 = vmatpush.bf16.msra.mxu1 %v446_v9 }
  0x26   :  { %308 = vmatpush.bf16.msra.mxu2 %v455_v21 }
  0x28   :  { %150 = vmatpush.bf16.msra.mxu0 %v437_v10 }
  0x29   :  { %230 = vmatpush.bf16.msra.mxu1 %v445_v11 }
  0x2a   :  { %309 = vmatpush.bf16.msra.mxu2 %v454_v22 }
  0x2c   :  { %151 = vmatpush.bf16.msra.mxu0 %v436_v12 }
  0x2d   :  { %231 = vmatpush.bf16.msra.mxu1 %v444_v16 }
  0x2e   :  { %310 = vmatpush.bf16.msra.mxu2 %v453_v23 }
  0x30   :  { %152 = vmatpush.bf16.msra.mxu0 %v435_v13 }
  0x31   :  { %232 = vmatpush.bf16.msra.mxu1 %v443_v17 }
  0x32   :  { %311 = vmatpush.bf16.msra.mxu2 %v452_v29 }
  0x33   :  { %153 = vmatmul.bf16.vlgmr.msra.gmra.mxu0 %v80_v15 }
  0x36   :  { %312 = vmatpush.bf16.msra.mxu2 %v451_v30 }
  0xb0   :  { %v154_v24 = vpop.f32.mrf.mxu0 }
  0xb1   :  { %v158_v25 = vmul.f32 0.17677669, %v154_v24 }
  0xb3   :  { %v159_v26 = vmax.f32 %v158_v25, 0.0 }
  0xb5   :  { %v160_v27 = vpack.c.bf16 %v159_v26, %v159_v26 }
  0xb7   :  { %233 = vmatmul.bf16.vlgmr.msra.gmra.mxu1 %v160_v27 }
  0xb8   :  { %v156_v28 = vpop.f32.mrf.mxu0 }
 0x134   :  { %v234_v31 = vpop.f32.mrf.mxu1 }
 0x135   :  { %v238_v32 = vmul.f32 0.17677669, %v234_v31 }
 0x137   :  { %v239_v33 = vmax.f32 %v238_v32, 0.0 }
 0x139   :  { %v240_v34 = vpack.c.bf16 %v239_v33, %v239_v33 }
 0x13b   :  { %313 = vmatmul.bf16.vlgmr.msra.gmra.mxu2 %v240_v34 }
 0x13c   :  { %v236_v35 = vpop.f32.mrf.mxu1 }
 0x1be   :  { %v314_v36 = vpop.f32.mrf.mxu2 }
 0x1bf   :  { %v318_v37 = vmul.f32 0.125, %v314_v36 }
 0x1c1   :  { %319 = vst [vmem:[#allocation10] sm:$0xff] %v318_v37 }
 0x1c2   :  { %330 = dma.vmem_to_hbm [thread:$0]  %s326_s3, 128, %s328_s11, [#allocation4]  }
 0x1c6   :  { %v316_v38 = vpop.f32.mrf.mxu2 }
 0x1c7   :  { %592 = dma.done.wait [#allocation4], 128  }
 0x1c8   :  { %593 = vsyncadd [#allocation4], 4294967168 }
 0x1c9   :  { %335 = vsyncpa [#allocation3], 1 }
 0x1ca   :  { %336 = vsyncpa [#allocation6], 1 }
 0x1cb   :  { %337 = vsyncpa [#allocation9], 1 }
 0x1cc   :  { %338 = vsyncpa [#allocation4], 1 }

</bundles_post_ra>
